<compile_context>
chip_gen: v5e
topology: v5e:2x2
jax: 0.10.0
libtpu: 0.0.40
codegen_flags: <defaults>
</compile_context>

<pallas_src>
import functools
import math

import jax
import jax.numpy as jnp
import numpy as np
from jax.experimental import pallas as pl
from jax.experimental.pallas import tpu as pltpu

GAMMA = 0.5  # fixed in the module; gamma == 0.5 -> sqrt


def focal_loss_kernel(logits_ref, target_ref, z_ref, w_ref, bias_ref,
                      out_ref, acc_ref, *, b_total, b_tile):
    p = pl.program_id(0)                       # core-parallel split axis
    i = pl.program_id(1)                       # batch-tile reduction axis
    tile_idx = p * pl.num_programs(1) + i      # logical (unclamped) tile index

    logits = logits_ref[...]                   # [C, Bt]  f32 (lane-dense)
    target = target_ref[...]                   # [1, Bt]  i32
    zt = z_ref[...]                            # [D, Bt]  f32
    w_mat = w_ref[...]                         # [C, 2D]  fused, constant-folded weights
    bias = bias_ref[...]                       # [C, 1]   per-class constant (pre-scaled)

    n_class, bt = logits.shape

    # one_hot(target, C) with classes on sublanes
    class_ids = jax.lax.broadcasted_iota(jnp.int32, (n_class, bt), 0)
    onehot = (class_ids == target).astype(jnp.float32)                  # [C, Bt]

    # cross_entropy(reduction='none'): logsumexp(logits) - logits[target]
    m = jnp.max(logits, axis=0, keepdims=True)                          # [1, Bt]
    lse = jnp.log(jnp.sum(jnp.exp(logits - m), axis=0, keepdims=True)) + m
    ce = lse - jnp.sum(onehot * logits, axis=0, keepdims=True)          # [1, Bt]

    # Gaussian log-likelihood / (ln2 * n_pixel), all D-reduction + scalar
    # constants folded into one MXU matmul:  lik = W @ [z*z ; z] + bias'
    zcat = jnp.concatenate([zt * zt, zt], axis=0)                       # [2D, Bt]
    lik = jnp.dot(w_mat, zcat, preferred_element_type=jnp.float32) + bias  # [C, Bt]

    # sqrt(softmax(lik)[target]) without a log->exp round trip (gamma == 0.5)
    lmax = jnp.max(lik, axis=0, keepdims=True)                          # [1, Bt]
    denom = jnp.sum(jnp.exp(lik - lmax), axis=0, keepdims=True)         # [1, Bt]
    lik_tgt = jnp.sum(onehot * lik, axis=0, keepdims=True)              # [1, Bt]
    w_sqrt = jnp.exp(0.5 * (lik_tgt - lmax)) * jax.lax.rsqrt(denom)     # [1, Bt]

    focal = w_sqrt * ce                                                 # [1, Bt]

    # mask lanes past the true batch size (no wrapper padding; tail lanes and
    # clamped/duplicated tiles may contain garbage -> select, don't multiply)
    lane = jax.lax.broadcasted_iota(jnp.int32, (1, bt), 1)
    valid = (tile_idx * b_tile + lane) < b_total
    partial = jnp.sum(jnp.where(valid, focal, 0.0), axis=-1, keepdims=True)  # [1, 1]

    @pl.when(i == 0)
    def _():
        acc_ref[...] = jnp.zeros_like(acc_ref)

    acc_ref[...] += partial

    @pl.when(i == pl.num_programs(1) - 1)
    def _():
        out_ref[...] = acc_ref[...]


def _pick_b_tile(b_total, requested):
    if requested is None:
        if b_total <= 1024:
            return b_total
        requested = 2048 if b_total >= 8192 else 1024
    if requested >= b_total:
        return b_total
    # lane-dim blocks smaller than the array must be a multiple of 128
    return max(128, (requested // 128) * 128)


def focal_loss(logits, target, z, mu, log_sd, *, b_tile=None, n_split=None):
    B, C = logits.shape
    D = z.shape[1]
    n_pixel = D
    scale = 1.0 / (math.log(2.0) * n_pixel)

    # Lane-dense (batch-on-lanes) operands.  In a real pipeline the producer
    # would emit these layouts directly; here it is wrapper-side layout plumbing.
    logits_t = logits.astype(jnp.float32).T                             # [C, B]
    z_t = z.astype(jnp.float32).T                                       # [D, B]
    target_row = target.astype(jnp.int32).reshape(1, B)                 # [1, B]
    mu = mu.astype(jnp.float32)
    log_sd = log_sd.astype(jnp.float32)

    # Class-only constants (mu / log_sd are fixed model params) with every
    # scalar factor folded in, so the kernel does one matmul and one add.
    inv_var = jnp.exp(-2.0 * log_sd)                                    # [C, D]
    w_mat = (-0.5 * scale) * jnp.concatenate(
        [inv_var, -2.0 * mu * inv_var], axis=1)                         # [C, 2D]
    bias = scale * (-0.5 * D * math.log(2.0 * math.pi)
                    - jnp.sum(log_sd, axis=-1)
                    - 0.5 * jnp.sum(mu * mu * inv_var, axis=-1))        # [C]
    bias = bias.reshape(C, 1)                                           # [C, 1]

    b_tile = _pick_b_tile(B, b_tile)
    num_tiles = pl.cdiv(B, b_tile)
    if n_split is None:
        n_split = 2 if num_tiles >= 2 else 1
    tiles_per_split = pl.cdiv(num_tiles, n_split)

    # Clamp block indices so a (possibly) over-hanging last split never issues
    # an out-of-range DMA; the kernel masks those lanes to zero anyway.
    def batch_map(p, i):
        return (0, jnp.minimum(p * tiles_per_split + i, num_tiles - 1))

    out = pl.pallas_call(
        functools.partial(focal_loss_kernel, b_total=B, b_tile=b_tile),
        out_shape=jax.ShapeDtypeStruct((n_split, 1, 1), jnp.float32),
        grid_spec=pltpu.PrefetchScalarGridSpec(
            num_scalar_prefetch=0,
            grid=(n_split, tiles_per_split),
            in_specs=[
                pl.BlockSpec((C, b_tile), batch_map),          # logits.T (streamed)
                pl.BlockSpec((1, b_tile), batch_map),          # target row (streamed)
                pl.BlockSpec((D, b_tile), batch_map),          # z.T (streamed)
                pl.BlockSpec((C, 2 * D), lambda p, i: (0, 0)),  # fused weights (resident)
                pl.BlockSpec((C, 1), lambda p, i: (0, 0)),      # per-class bias (resident)
            ],
            out_specs=pl.BlockSpec((None, 1, 1), lambda p, i: (p, 0, 0)),  # per-split partial
            scratch_shapes=[pltpu.VMEM((1, 1), jnp.float32)],  # running sum
        ),
        compiler_params=pltpu.CompilerParams(
            dimension_semantics=("parallel", "arbitrary"),      # split x reduction
            vmem_limit_bytes=32 * 1024 * 1024,                  # safe on v5e/v6e/v7x
        ),
    )(logits_t, target_row, z_t, w_mat, bias)

    return jnp.sum(out) / B


def focal_loss_ref(logits, target, z, mu, log_sd):
    # plain-JAX reference mirroring the PyTorch module
    n_pixel = z.shape[1]
    lse = jax.scipy.special.logsumexp(logits, axis=-1)
    ce = lse - jnp.take_along_axis(logits, target[:, None], axis=-1)[:, 0]
    log_p = (-0.5 * math.log(2.0 * math.pi) - log_sd[None]
             - 0.5 * (z[:, None, :] - mu[None]) ** 2 / jnp.exp(2.0 * log_sd)[None])
    likelihood = log_p.sum(-1) / (math.log(2.0) * n_pixel)
    weights_vec = jax.nn.softmax(likelihood, axis=-1)
    onehot = jax.nn.one_hot(target, logits.shape[1], dtype=logits.dtype)
    weights = (onehot * weights_vec).sum(-1)
    return jnp.mean(jnp.power(weights, GAMMA) * ce)


if __name__ == "__main__":
    def run_case(key, B, C, D, **kw):
        k1, k2, k3, k4, k5 = jax.random.split(key, 5)
        logits = jax.random.normal(k1, (B, C), dtype=jnp.float32)
        target = jax.random.randint(k2, (B,), 0, C, dtype=jnp.int32)
        z = jax.random.normal(k3, (B, D), dtype=jnp.float32)
        # deterministic synthetic distribution params (stand-in for mu.pt / log_sd.pt)
        mu = 0.5 * jax.random.normal(k4, (C, D), dtype=jnp.float32)
        log_sd = 0.1 * jax.random.normal(k5, (C, D), dtype=jnp.float32)

        loss = focal_loss(logits, target, z, mu, log_sd, **kw)
        jax.block_until_ready(loss)
        loss_ref = focal_loss_ref(logits, target, z, mu, log_sd)
        np.testing.assert_allclose(np.asarray(loss), np.asarray(loss_ref),
                                   rtol=2e-4, atol=1e-5)

    key = jax.random.PRNGKey(0)
    k0, k1, k2 = jax.random.split(key, 3)
    # primary small-shape case (single tile, single split)
    run_case(k0, 8, 4, 32)
    # multi-tile case: 6 tiles, 2-way split, partial last tile (masked tail lanes)
    run_case(k1, 700, 4, 32, b_tile=128)
    # odd tile count: exercises the clamped-index / fully-masked duplicate tile path
    run_case(k2, 300, 4, 32, b_tile=128)
    print("KERNEL_OK")
</pallas_src>

<mosaic_0001>
module attributes {stable_mosaic.version = 11 : i64} {
  func.func @focal_loss_kernel(%arg0: i32, %arg1: i32, %arg2: memref<4x8xf32, #tpu.memory_space<vmem>>, %arg3: memref<1x8xi32, #tpu.memory_space<vmem>>, %arg4: memref<32x8xf32, #tpu.memory_space<vmem>>, %arg5: memref<4x64xf32, #tpu.memory_space<vmem>>, %arg6: memref<4x1xf32, #tpu.memory_space<vmem>>, %arg7: memref<1x1x1xf32, #tpu.memory_space<vmem>>, %arg8: memref<1x1xf32, #tpu.memory_space<vmem>>) attributes {dimension_semantics = [#tpu.dimension_semantics<parallel>, #tpu.dimension_semantics<arbitrary>], iteration_bounds = array<i64: 1, 1>, scalar_prefetch = 0 : i64, scratch_operands = 1 : i64, tpu.core_type = #tpu.core_type<tc>, window_params = [{transform_indices = @transform_0, window_bounds = array<i64: 4, 8>}, {transform_indices = @transform_1, window_bounds = array<i64: 1, 8>}, {transform_indices = @transform_2, window_bounds = array<i64: 32, 8>}, {pipeline_mode = #tpu.pipeline_mode<synchronous>, transform_indices = @transform_3, window_bounds = array<i64: 4, 64>}, {pipeline_mode = #tpu.pipeline_mode<synchronous>, transform_indices = @transform_4, window_bounds = array<i64: 4, 1>}, {transform_indices = @transform_5, window_bounds = array<i64: 1, 1, 1>}]} {
    %c1_i32 = arith.constant 1 : i32
    %0 = arith.muli %arg0, %c1_i32 : i32
    %1 = arith.addi %0, %arg1 : i32
    %c0 = arith.constant 0 : index
    %c0_0 = arith.constant 0 : index
    %2 = vector.load %arg2[%c0, %c0_0] : memref<4x8xf32, #tpu.memory_space<vmem>>, vector<4x8xf32>
    %c0_1 = arith.constant 0 : index
    %c0_2 = arith.constant 0 : index
    %3 = vector.load %arg3[%c0_1, %c0_2] : memref<1x8xi32, #tpu.memory_space<vmem>>, vector<1x8xi32>
    %c0_3 = arith.constant 0 : index
    %c0_4 = arith.constant 0 : index
    %4 = vector.load %arg4[%c0_3, %c0_4] : memref<32x8xf32, #tpu.memory_space<vmem>>, vector<32x8xf32>
    %c0_5 = arith.constant 0 : index
    %c0_6 = arith.constant 0 : index
    %5 = vector.load %arg5[%c0_5, %c0_6] : memref<4x64xf32, #tpu.memory_space<vmem>>, vector<4x64xf32>
    %c0_7 = arith.constant 0 : index
    %c0_8 = arith.constant 0 : index
    %6 = vector.load %arg6[%c0_7, %c0_8] : memref<4x1xf32, #tpu.memory_space<vmem>>, vector<4x1xf32>
    %7 = tpu.iota {dimensions = array<i32: 0>} : vector<4x8xi32>
    %8 = vector.broadcast %3 : vector<1x8xi32> to vector<4x8xi32>
    %9 = arith.cmpi eq, %7, %8 : vector<4x8xi32>
    %10 = arith.extui %9 : vector<4x8xi1> to vector<4x8xi32>
    %11 = arith.sitofp %10 : vector<4x8xi32> to vector<4x8xf32>
    %cst = arith.constant dense<0xFF800000> : vector<8xf32>
    %12 = vector.multi_reduction <maximumf>, %2, %cst [0] : vector<4x8xf32> to vector<8xf32>
    %13 = vector.shape_cast %12 : vector<8xf32> to vector<1x8xf32>
    %14 = vector.broadcast %13 : vector<1x8xf32> to vector<4x8xf32>
    %15 = arith.subf %2, %14 : vector<4x8xf32>
    %16 = math.exp %15 : vector<4x8xf32>
    %cst_9 = arith.constant dense<0.000000e+00> : vector<8xf32>
    %17 = vector.multi_reduction <add>, %16, %cst_9 [0] : vector<4x8xf32> to vector<8xf32>
    %18 = vector.shape_cast %17 : vector<8xf32> to vector<1x8xf32>
    %19 = math.log %18 : vector<1x8xf32>
    %20 = arith.addf %19, %13 : vector<1x8xf32>
    %21 = arith.mulf %11, %2 : vector<4x8xf32>
    %cst_10 = arith.constant dense<0.000000e+00> : vector<8xf32>
    %22 = vector.multi_reduction <add>, %21, %cst_10 [0] : vector<4x8xf32> to vector<8xf32>
    %23 = vector.shape_cast %22 : vector<8xf32> to vector<1x8xf32>
    %24 = arith.subf %20, %23 : vector<1x8xf32>
    %25 = arith.mulf %4, %4 : vector<32x8xf32>
    %26 = tpu.concatenate %25, %4 in 0 : vector<32x8xf32>, vector<32x8xf32> -> vector<64x8xf32>
    %cst_11 = arith.constant dense<0.000000e+00> : vector<4x8xf32>
    %27 = tpu.matmul %5, %26, %cst_11 {dimension_numbers = #tpu.dot_dimension_numbers<[1], [0], [0], [1], [0, 0, 1, 1], [], []>} : vector<4x64xf32>, vector<64x8xf32>, vector<4x8xf32> -> vector<4x8xf32>
    %28 = vector.broadcast %6 : vector<4x1xf32> to vector<4x8xf32>
    %29 = arith.addf %27, %28 : vector<4x8xf32>
    %cst_12 = arith.constant dense<0xFF800000> : vector<8xf32>
    %30 = vector.multi_reduction <maximumf>, %29, %cst_12 [0] : vector<4x8xf32> to vector<8xf32>
    %31 = vector.shape_cast %30 : vector<8xf32> to vector<1x8xf32>
    %32 = vector.broadcast %31 : vector<1x8xf32> to vector<4x8xf32>
    %33 = arith.subf %29, %32 : vector<4x8xf32>
    %34 = math.exp %33 : vector<4x8xf32>
    %cst_13 = arith.constant dense<0.000000e+00> : vector<8xf32>
    %35 = vector.multi_reduction <add>, %34, %cst_13 [0] : vector<4x8xf32> to vector<8xf32>
    %36 = vector.shape_cast %35 : vector<8xf32> to vector<1x8xf32>
    %37 = arith.mulf %11, %29 : vector<4x8xf32>
    %cst_14 = arith.constant dense<0.000000e+00> : vector<8xf32>
    %38 = vector.multi_reduction <add>, %37, %cst_14 [0] : vector<4x8xf32> to vector<8xf32>
    %39 = vector.shape_cast %38 : vector<8xf32> to vector<1x8xf32>
    %40 = arith.subf %39, %31 : vector<1x8xf32>
    %cst_15 = arith.constant 5.000000e-01 : f32
    %41 = vector.broadcast %cst_15 : f32 to vector<1x8xf32>
    %42 = arith.mulf %41, %40 : vector<1x8xf32>
    %43 = math.exp %42 : vector<1x8xf32>
    %44 = math.rsqrt %36 : vector<1x8xf32>
    %45 = arith.mulf %43, %44 : vector<1x8xf32>
    %46 = arith.mulf %45, %24 : vector<1x8xf32>
    %47 = tpu.iota {dimensions = array<i32: 1>} : vector<1x8xi32>
    %c8_i32 = arith.constant 8 : i32
    %48 = arith.muli %1, %c8_i32 : i32
    %49 = vector.broadcast %48 : i32 to vector<1x8xi32>
    %50 = arith.addi %49, %47 : vector<1x8xi32>
    %c8_i32_16 = arith.constant 8 : i32
    %51 = vector.broadcast %c8_i32_16 : i32 to vector<1x8xi32>
    %52 = arith.cmpi slt, %50, %51 : vector<1x8xi32>
    %cst_17 = arith.constant 0.000000e+00 : f32
    %53 = vector.broadcast %cst_17 : f32 to vector<1x8xf32>
    %54 = arith.select %52, %46, %53 : vector<1x8xi1>, vector<1x8xf32>
    %cst_18 = arith.constant dense<0.000000e+00> : vector<1xf32>
    %55 = vector.multi_reduction <add>, %54, %cst_18 [1] : vector<1x8xf32> to vector<1xf32>
    %56 = vector.shape_cast %55 : vector<1xf32> to vector<1x1xf32>
    %c0_i32 = arith.constant 0 : i32
    %57 = arith.cmpi eq, %arg1, %c0_i32 : i32
    %58 = arith.extui %57 : i1 to i32
    %c0_i32_19 = arith.constant 0 : i32
    %59 = arith.cmpi ne, %58, %c0_i32_19 : i32
    scf.if %59 {
      %cst_26 = arith.constant 0.000000e+00 : f32
      %66 = vector.broadcast %cst_26 : f32 to vector<1x1xf32>
      %c0_27 = arith.constant 0 : index
      %c0_28 = arith.constant 0 : index
      %67 = vector.load %arg8[%c0_27, %c0_28] : memref<1x1xf32, #tpu.memory_space<vmem>>, vector<1x1xf32>
      tpu.vector_store %arg8[%c0_27, %c0_28], %66 {strides = array<i32>} : memref<1x1xf32, #tpu.memory_space<vmem>>, vector<1x1xf32>,
    } else {
    }
    %c0_20 = arith.constant 0 : index
    %c0_21 = arith.constant 0 : index
    %60 = vector.load %arg8[%c0_20, %c0_21] : memref<1x1xf32, #tpu.memory_space<vmem>>, vector<1x1xf32>
    %61 = arith.addf %60, %56 : vector<1x1xf32>
    %c0_22 = arith.constant 0 : index
    %c0_23 = arith.constant 0 : index
    %62 = vector.load %arg8[%c0_22, %c0_23] : memref<1x1xf32, #tpu.memory_space<vmem>>, vector<1x1xf32>
    tpu.vector_store %arg8[%c0_22, %c0_23], %61 {strides = array<i32>} : memref<1x1xf32, #tpu.memory_space<vmem>>, vector<1x1xf32>,
    %c0_i32_24 = arith.constant 0 : i32
    %63 = arith.cmpi eq, %arg1, %c0_i32_24 : i32
    %64 = arith.extui %63 : i1 to i32
    %c0_i32_25 = arith.constant 0 : i32
    %65 = arith.cmpi ne, %64, %c0_i32_25 : i32
    scf.if %65 {
      %c0_26 = arith.constant 0 : index
      %c0_27 = arith.constant 0 : index
      %66 = vector.load %arg8[%c0_26, %c0_27] : memref<1x1xf32, #tpu.memory_space<vmem>>, vector<1x1xf32>
      %c0_28 = arith.constant 0 : index
      %c0_29 = arith.constant 0 : index
      %c0_30 = arith.constant 0 : index
      %67 = vector.load %arg7[%c0_28, %c0_29, %c0_30] : memref<1x1x1xf32, #tpu.memory_space<vmem>>, vector<1x1x1xf32>
      %68 = vector.shape_cast %67 : vector<1x1x1xf32> to vector<1x1xf32>
      %69 = vector.shape_cast %66 : vector<1x1xf32> to vector<1x1x1xf32>
      tpu.vector_store %arg7[%c0_28, %c0_29, %c0_30], %69 {strides = array<i32>} : memref<1x1x1xf32, #tpu.memory_space<vmem>>, vector<1x1x1xf32>,
    } else {
    }
    return
  }
  func.func @transform_0(%arg0: i32, %arg1: i32) -> (i32, i32) {
    %c1_i32 = arith.constant 1 : i32
    %0 = arith.muli %arg0, %c1_i32 : i32
    %1 = arith.addi %0, %arg1 : i32
    %c0_i32 = arith.constant 0 : i32
    %2 = arith.minsi %1, %c0_i32 : i32
    %c0_i32_0 = arith.constant 0 : i32
    %c0_i32_1 = arith.constant 0 : i32
    return %c0_i32_0, %2 : i32, i32
  }
  func.func @transform_1(%arg0: i32, %arg1: i32) -> (i32, i32) {
    %c1_i32 = arith.constant 1 : i32
    %0 = arith.muli %arg0, %c1_i32 : i32
    %1 = arith.addi %0, %arg1 : i32
    %c0_i32 = arith.constant 0 : i32
    %2 = arith.minsi %1, %c0_i32 : i32
    %c0_i32_0 = arith.constant 0 : i32
    %c0_i32_1 = arith.constant 0 : i32
    return %c0_i32_0, %2 : i32, i32
  }
  func.func @transform_2(%arg0: i32, %arg1: i32) -> (i32, i32) {
    %c1_i32 = arith.constant 1 : i32
    %0 = arith.muli %arg0, %c1_i32 : i32
    %1 = arith.addi %0, %arg1 : i32
    %c0_i32 = arith.constant 0 : i32
    %2 = arith.minsi %1, %c0_i32 : i32
    %c0_i32_0 = arith.constant 0 : i32
    %c0_i32_1 = arith.constant 0 : i32
    return %c0_i32_0, %2 : i32, i32
  }
  func.func @transform_3(%arg0: i32, %arg1: i32) -> (i32, i32) {
    %c0_i32 = arith.constant 0 : i32
    %c0_i32_0 = arith.constant 0 : i32
    %c0_i32_1 = arith.constant 0 : i32
    return %c0_i32, %c0_i32_0 : i32, i32
  }
  func.func @transform_4(%arg0: i32, %arg1: i32) -> (i32, i32) {
    %c0_i32 = arith.constant 0 : i32
    %c0_i32_0 = arith.constant 0 : i32
    %c0_i32_1 = arith.constant 0 : i32
    return %c0_i32, %c0_i32_0 : i32, i32
  }
  func.func @transform_5(%arg0: i32, %arg1: i32) -> (i32, i32, i32) {
    %c0_i32 = arith.constant 0 : i32
    %c0_i32_0 = arith.constant 0 : i32
    %c0_i32_1 = arith.constant 0 : i32
    return %arg0, %c0_i32, %c0_i32_0 : i32, i32, i32
  }
}

</mosaic_0001>

<bundles_post_ra>
// kernel: tpu_custom_call.1
= control target key start
LH: loop header
LB: loop body
LE: loop exit
PB: predicated region body
PF: predicated region fallthrough
CT: control target
= control target key end

     0   :  { %v318_v2 = vmov 0   ;;  %s393_s0 = inlined_call_operand.vmem [shape: f32[4,8], index: 0, kind: input, shape index: {}]   ;;  %s394_s1 = inlined_call_operand.vmem [shape: s32[1,8], index: 1, kind: input, shape index: {}]   ;;  %s395_s2 = inlined_call_operand.vmem [shape: f32[32,8], index: 2, kind: input, shape index: {}]   ;;  %s396_s3 = inlined_call_operand.vmem [shape: f32[4,64], index: 3, kind: input, shape index: {}]   ;;  %s397_s4 = inlined_call_operand.vmem [shape: f32[4,1], index: 4, kind: input, shape index: {}]   ;;  %s398_s5 = inlined_call_operand.hbm [shape: f32[1,1,1], index: 5, kind: output, shape index: {}]  }
   0x1   :  { %v105_v0 = vld [vmem:[%s395_s2 + $0x18] sm:$0xff]  ;;  %v104_v1 = vld [vmem:[%s395_s2 + $0x10] sm:$0xff]  ;;  %280 = vset.pattern.permute.xlu0 %v318_v2  ;;  %v107_v3 = vld [vmem:[%s397_s4] sm:$0xf] }
   0x2   :  { %165 = vmatpush.msra.mxu0 %v105_v0  ;;  %v103_v4 = vld [vmem:[%s395_s2 + $0x8] sm:$0xff]  ;;  %150 = vperm.xlu0 %280, %v107_v3  }
   0x3   :  { %10 = vsyncpa [#allocation4], 0  ;;  %v102_v5 = vld [vmem:[%s395_s2] sm:$0xff]  ;;  %v147_v6 = vmul.f32 %v105_v0, %v105_v0  ;;  %v146_v7 = vmul.f32 %v104_v1, %v104_v1  ;;  %v145_v8 = vmul.f32 %v103_v4, %v103_v4  ;;  %vm153_vm0 = vcmask 523264   ;;  %s251_s8 = sshll.u32 %s398_s5, 4  ;;  %s252_s8 = int_to_ptr.hbm [resolvable:$true] %s251_s8 }
   0x4   :  { %166 = vmatpush.msra.mxu0 %v104_v1  ;;  %v144_v9 = vmul.f32 %v102_v5, %v102_v5  ;;  %v106_v10 = vld [vmem:[%s396_s3] sm:$0xf]  ;;  %vm114_vm1 = vcmask 60416   ;;  %v108_v19 = vlaneseq  ;;  %v319_v29 = vmov 0.0  }
   0x5   :  { %v100_v11 = vld [vmem:[%s393_s0] sm:$0xf]  ;;  %vm233_vm3 = vcmask 0   ;;  %vm225_vm8 = vcmask 64512   ;;  %s320_s0 = smov [#allocation3]  }
   0x6   :  { %167 = vmatpush.msra.mxu0 %v103_v4  ;;  %v115_v12 = vsel %vm114_vm1, %v100_v11, -inf  ;;  %v109_v22 = vshrl.u32 %v108_v19, 7  ;;  %v281_v23 = vld [vmem:[%s394_s1] ss:$0 sm:$0xff]  ;;  %234 = vst.msk [vmem:[#allocation2] sm:$0x1] %vm233_vm3, %v319_v29 }
   0x7   :  { %v116_v13 = vrot.slane %v115_v12, 4  ;;  %s249_s1 = sshll.u32 %s320_s0, 4  ;;  %s250_s1 = int_to_ptr.vmem [resolvable:$true] %s249_s1 }
   0x8   :  { %168 = vmatpush.msra.mxu0 %v102_v5  ;;  %vm111_vm2 = vcmp.eq.s32.totalorder %v109_v22, %v281_v23 }
   0x9   :  { %v117_v14 = vmax.f32 %v115_v12, %v116_v13  ;;  %v275_v30 = vsel %vm111_vm2, 1.0, %v319_v29 }
   0xa   :  { %169 = vmatpush.msra.mxu0 %v147_v6  ;;  %v135_v48 = vmul.f32 %v275_v30, %v100_v11 }
   0xb   :  { %v118_v15 = vrot.slane %v117_v14, 2 }
   0xc   :  { %170 = vmatpush.msra.mxu0 %v146_v7  ;;  %v136_v54 = vsel %vm114_vm1, %v135_v48, 0.0 }
   0xd   :  { %v119_v16 = vmax.f32 %v117_v14, %v118_v15  ;;  %v137_v58 = vrot.slane %v136_v54, 4 }
   0xe   :  { %171 = vmatpush.msra.mxu0 %v145_v8 }
   0xf   :  { %v120_v17 = vrot.slane %v119_v16, 1  ;;  %v138_v63 = vadd.f32 %v137_v58, %v136_v54 }
  0x10   :  { %172 = vmatpush.msra.mxu0 %v144_v9 }
  0x11   :  { %276 = vmatmul.msk.f32.vlgmr.msra.gmra.mxu0 %vm153_vm0, %v106_v10  ;;  %v373_v18 = vmax.f32 %v119_v16, %v120_v17  ;;  %v139_v3 = vrot.slane %v138_v63, 2 }
  0x13   :  { %v122_v20 = vsub.f32 %v100_v11, %v373_v18  ;;  %v140_v5 = vadd.f32 %v139_v3, %v138_v63 }
  0x15   :  { %v123_v24 = vmul.f32 1.442695, %v122_v20  ;;  %v141_v11 = vrot.slane %v140_v5, 1  ;;  %v219_v20 = vand.u32 127, %v108_v19 }
  0x17   :  { %282 = vpow2.f32 %v123_v24  ;;  %v142_v15 = vadd.f32 %v141_v11, %v140_v5  ;;  %vm223_vm7 = vcmp.lt.s32.totalorder %v219_v20, 8 }
  0x1d   :  { %v283_v34 = vpop.eup %282 }
  0x1e   :  { %v125_v38 = vsel %vm114_vm1, %v283_v34, 0.0 }
  0x1f   :  { %v126_v41 = vrot.slane %v125_v38, 4 }
  0x21   :  { %v127_v45 = vadd.f32 %v126_v41, %v125_v38 }
  0x23   :  { %v128_v47 = vrot.slane %v127_v45, 2 }
  0x25   :  { %v129_v52 = vadd.f32 %v128_v47, %v127_v45 }
  0x27   :  { %v130_v57 = vrot.slane %v129_v52, 1 }
  0x29   :  { %v131_v62 = vadd.f32 %v130_v57, %v129_v52 }
  0x74   :  { %v151_v21 = vpop.permute.xlu0 %150 }
  0x8e   :  { %v174_v25 = vpop.f32.mrf.mxu0 }
  0x8f   :  { %v175_v26 = vadd.f32 %v174_v25, %v151_v21 }
  0x91   :  { %v177_v27 = vsel %vm114_vm1, %v175_v26, -inf  ;;  %v194_v33 = vmul.f32 %v275_v30, %v175_v26 }
  0x92   :  { %v178_v28 = vrot.slane %v177_v27, 4 }
  0x93   :  { %v195_v37 = vsel %vm114_vm1, %v194_v33, 0.0 }
  0x94   :  { %v179_v31 = vmax.f32 %v177_v27, %v178_v28  ;;  %v196_v40 = vrot.slane %v195_v37, 4  ;;  %v235_v28 = vld [vmem:[#allocation2] sm:$0x1] }
  0x96   :  { %v180_v32 = vrot.slane %v179_v31, 2  ;;  %v197_v44 = vadd.f32 %v196_v40, %v195_v37 }
  0x98   :  { %v181_v35 = vmax.f32 %v179_v31, %v180_v32  ;;  %v198_v46 = vrot.slane %v197_v44, 2 }
  0x9a   :  { %v182_v36 = vrot.slane %v181_v35, 1  ;;  %v199_v51 = vadd.f32 %v198_v46, %v197_v44 }
  0x9c   :  { %v183_v39 = vmax.f32 %v181_v35, %v182_v36  ;;  %v200_v56 = vrot.slane %v199_v51, 1 }
  0x9e   :  { %v184_v42 = vsub.f32 %v175_v26, %v183_v39  ;;  %v201_v61 = vadd.f32 %v200_v56, %v199_v51 }
  0xa0   :  { %v185_v43 = vmul.f32 1.442695, %v184_v42  ;;  %v202_v2 = vsub.f32 %v201_v61, %v183_v39 }
  0xa2   :  { %284 = vpow2.f32 %v185_v43  ;;  %v203_v4 = vmul.f32 0.5, %v202_v2 }
  0xa3   :  { %286 = vlog2.f32 %v131_v62 }
  0xa4   :  { %v204_v8 = vmul.f32 1.442695, %v203_v4 }
  0xa8   :  { %v285_v49 = vpop.eup %284 }
  0xa9   :  { %v187_v50 = vsel %vm114_vm1, %v285_v49, 0.0  ;;  %v287_v6 = vpop.eup %286 }
  0xaa   :  { %v188_v53 = vrot.slane %v187_v50, 4  ;;  %v133_v10 = vmul.f32 0.6931472, %v287_v6 }
  0xac   :  { %v189_v55 = vadd.f32 %v188_v53, %v187_v50  ;;  %v134_v14 = vadd.f32 %v133_v10, %v373_v18 }
  0xae   :  { %v190_v59 = vrot.slane %v189_v55, 2  ;;  %v143_v21 = vsub.f32 %v134_v14, %v142_v15 }
  0xb0   :  { %v191_v60 = vadd.f32 %v190_v59, %v189_v55 }
  0xb2   :  { %v192_v0 = vrot.slane %v191_v60, 1 }
  0xb4   :  { %v193_v1 = vadd.f32 %v192_v0, %v191_v60 }
  0xb6   :  { %288 = vrsqrt.f32 %v193_v1  ;;  %vm212_vm5 = vweird.f32 %v193_v1 }
  0xb7   :  { %290 = vpow2.f32 %v204_v8 }
  0xbc   :  { %v289_v7 = vpop.eup %288 }
  0xbd   :  { %v207_v9 = vmul.f32 %v289_v7, %v193_v1  ;;  %vm213_vm4 = vweird.f32 %v289_v7  ;;  %v291_v22 = vpop.eup %290 }
  0xbe   :  { %vm214_vm6 = vmor %vm212_vm5, %vm213_vm4 }
  0xbf   :  { %v208_v12 = vmul.f32 %v289_v7, %v207_v9 }
  0xc1   :  { %v209_v13 = vmul.f32 0.5, %v208_v12 }
  0xc3   :  { %v210_v16 = vsub.f32 1.5, %v209_v13 }
  0xc5   :  { %v211_v17 = vmul.f32 %v289_v7, %v210_v16 }
  0xc7   :  { %v215_v23 = vsel %vm214_vm6, %v289_v7, %v211_v17 }
  0xc8   :  { %v216_v24 = vmul.f32 %v291_v22, %v215_v23 }
  0xca   :  { %v217_v25 = vmul.f32 %v216_v24, %v143_v21 }
  0xcc   :  { %v224_v26 = vsel %vm223_vm7, %v217_v25, 0.0 }
  0xcd   :  { %v226_v27 = vsel %vm225_vm8, %v224_v26, 0.0 }
  0xce   :  { %227 = vadd.xlane.f32.xlu0 %v226_v27 }
 0x141   :  { %v228_v18 = vpop.xlane.xlu0 %227 }
 0x142   :  { %v236_v29 = vadd.f32 %v235_v28, %v228_v18 }
 0x144   :  { %238 = vst.msk [vmem:[#allocation2] sm:$0x1] %vm233_vm3, %v236_v29 }
 0x14b   :  { %v242_v19 = vld [vmem:[#allocation2] sm:$0x1] }
 0x14c   :  { %243 = vst.msk [vmem:[#allocation3] sm:$0x1] %vm233_vm3, %v242_v19 }
 0x14d   :  { %254 = dma.vmem_to_hbm [thread:$0]  %s250_s1, 16, %s252_s8, [#allocation4]  }
 0x14e   :  { %316 = dma.done.wait [#allocation4], 16  }
 0x14f   :  { %317 = vsyncadd [#allocation4], 4294967280 }
 0x150   :  { %259 = vsyncpa [#allocation4], 1 }

</bundles_post_ra>
